<compile_context>
chip_gen: v7x
topology: tpu7x:2x2x1
jax: 0.10.0
libtpu: 0.0.40
codegen_flags: <defaults>
</compile_context>

<pallas_src>
import copy
import numpy as np
import jax
import jax.numpy as jnp
from jax import lax
from jax.experimental import pallas as pl
from jax.experimental.pallas import tpu as pltpu


def _round_up(x, m):
    return ((x + m - 1) // m) * m


def _make_sum_density_kernel(f_total, tb, tf, need_f_mask):
    """Build the streaming per-row reduction kernel.

    Grid              : (batch_tiles, feature_tiles), reduction axis LAST.
    x_ref   (tb, tf)  : input tile (auto double-buffered through VMEM).
    o_ref   (tb, 1)   : output tile, resident across the feature axis.
    acc_ref (tb, 128) : lane-dense float32 accumulator (VPU-only updates; the
                        single cross-lane XLU reduce happens at finalize).
    """
    n_chunks = tf // 128

    def kernel(x_ref, o_ref, acc_ref):
        k = pl.program_id(1)

        @pl.when(k == 0)
        def _init():
            acc_ref[...] = jnp.zeros_like(acc_ref)

        col_base = k * tf  # first global feature column of this tile

        def accumulate(start):
            chunk = x_ref[:, pl.ds(start, 128)].astype(jnp.float32)
            if need_f_mask:
                # Edge blocks are padded with unspecified values by the
                # pipeline (no jnp.pad on the host side): zero out-of-range
                # lanes before accumulating.  One VPU select per vreg,
                # fully hidden under the HBM DMA.
                col = (col_base + start
                       + lax.broadcasted_iota(jnp.int32, (tb, 128), 1))
                chunk = jnp.where(col < f_total, chunk, 0.0)
            acc_ref[...] += chunk

        if n_chunks <= 16:
            # Short fixed trip count: unroll at trace time (static slices,
            # pure VPU adds into the VMEM accumulator).
            for c in range(n_chunks):
                accumulate(c * 128)
        else:
            @pl.loop(0, n_chunks)
            def _(c):
                accumulate(pl.multiple_of(c * 128, 128))

        @pl.when(k == pl.num_programs(1) - 1)
        def _finalize():
            # Single cross-lane reduce per batch tile, then cast back to the
            # input dtype (matches torch.sum semantics; accumulation is f32,
            # so sub-32-bit inputs lose precision only on this final cast).
            o_ref[...] = jnp.sum(acc_ref[...], axis=-1,
                                 keepdims=True).astype(o_ref.dtype)

    return kernel


def sum_density_pallas(x_flat, max_feature_tile=None):
    """Per-row full reduction: (B, F) -> (B,) as a tiled streaming kernel."""
    B, F = x_flat.shape
    dtype = x_flat.dtype
    itemsize = jnp.dtype(dtype).itemsize

    # Minimum second-to-last block dim for packed sublanes per dtype width.
    sublane_min = {4: 8, 2: 16, 1: 32}.get(itemsize, 8)

    # Batch tile: keep >= 4 batch tiles when B permits so the "parallel"
    # batch grid axis can shard across both v7x TensorCores; capped at 256
    # rows and always a multiple of the sublane minimum.
    tb = min(256, _round_up(max(1, pl.cdiv(B, 4)), sublane_min))

    # Feature tile: lane-dense, as large as a ~16 MiB double-buffered input
    # budget allows (amortizes the ~0.35 us per-grid-step overhead; most
    # impactful on v7x's 3.2 TB/s HBM).
    in_vmem_budget = 16 * 1024 * 1024
    tf_cap = max(128, (in_vmem_budget // (2 * tb * itemsize)) // 128 * 128)
    tf = min(_round_up(F, 128), tf_cap)
    if max_feature_tile is not None:
        tf = min(tf, max(128, (max_feature_tile // 128) * 128))

    grid = (pl.cdiv(B, tb), pl.cdiv(F, tf))
    need_f_mask = (F % tf) != 0

    kernel = _make_sum_density_kernel(F, tb, tf, need_f_mask)

    out = pl.pallas_call(
        kernel,
        out_shape=jax.ShapeDtypeStruct((B, 1), dtype),
        grid=grid,
        # If profiling shows exposed DMA on v7x after enlarging tiles, a
        # third input buffer (pipeline_mode=pl.Buffered(3)) still fits the
        # VMEM budget; not enabled by default.
        in_specs=[pl.BlockSpec((tb, tf), lambda i, k: (i, k))],
        out_specs=pl.BlockSpec((tb, 1), lambda i, k: (i, 0)),
        scratch_shapes=[pltpu.VMEM((tb, 128), jnp.float32)],
        compiler_params=pltpu.CompilerParams(
            # Batch tiles are independent -> "parallel" (megacore on v7x);
            # feature axis is the reduction -> "arbitrary", kept last.
            dimension_semantics=("parallel", "arbitrary"),
            vmem_limit_bytes=40 * 1024 * 1024,
        ),
    )(x_flat)
    return out[:, 0]


class ModulePallas:
    """JAX/Pallas mirror of the PyTorch `Module_` prototype."""

    propagate_density = False

    # Below this many input bytes the pallas_call fixed cost dominates and
    # XLA's fused reduction is already at roofline -> plain jnp.sum.
    _FASTPATH_BYTES = 1 << 20

    def __init__(self, label=None):
        self.label = label
        self._params = []  # Module_ defines no parameters

    def forward(self, x, log0=0):
        # Abstract in the reference implementation (`pass` -> returns None).
        # TODO(synk): Jacobian-handling forward/backward exist only in
        # subclasses of Module_; nothing to lower here.
        return None

    def backward(self, x, log0=0):
        return None

    def transfer(self, **kwargs):
        return copy.deepcopy(self)

    @property
    def npar(self):
        return sum(int(np.prod(p.shape)) for p in self._params)

    def sum_density(self, x, use_pallas=None):
        if self.propagate_density:
            return x
        B = x.shape[0]
        x_flat = x.reshape(B, -1)
        if use_pallas is None:
            nbytes = x_flat.size * jnp.dtype(x_flat.dtype).itemsize
            use_pallas = nbytes >= self._FASTPATH_BYTES
        if not use_pallas:
            return jnp.sum(x_flat, axis=1)
        return sum_density_pallas(x_flat)


if __name__ == "__main__":
    key = jax.random.PRNGKey(0)
    mod = ModulePallas(label="test")

    # Small NCHW input consistent with a normalizing-flow field configuration.
    x = jax.random.normal(key, (2, 4, 16, 16), dtype=jnp.float32)
    dens = jax.block_until_ready(mod.sum_density(x, use_pallas=True))
    ref = jnp.sum(x, axis=(1, 2, 3))
    assert dens.shape == (2,)
    np.testing.assert_allclose(np.asarray(dens), np.asarray(ref),
                               rtol=1e-6, atol=1e-5)

    # Non-aligned shape: exercises the in-kernel feature-tail lane mask and
    # the batch tail (B=3 not a multiple of 8, F=765 not a multiple of 128).
    x2 = jax.random.normal(key, (3, 5, 17, 9), dtype=jnp.float32)
    dens2 = jax.block_until_ready(mod.sum_density(x2, use_pallas=True))
    ref2 = jnp.sum(x2, axis=(1, 2, 3))
    np.testing.assert_allclose(np.asarray(dens2), np.asarray(ref2),
                               rtol=1e-6, atol=1e-4)

    # Several batch tiles + feature tail mask.
    x3 = jax.random.normal(key, (37, 3, 20, 20), dtype=jnp.float32)
    dens3 = jax.block_until_ready(mod.sum_density(x3, use_pallas=True))
    ref3 = jnp.sum(x3, axis=(1, 2, 3))
    np.testing.assert_allclose(np.asarray(dens3), np.asarray(ref3),
                               rtol=1e-6, atol=1e-3)

    # Larger feature count: exercises the pl.loop chunk path (>16 chunks).
    x4 = jax.random.normal(key, (4, 8, 32, 32), dtype=jnp.float32)
    dens4 = jax.block_until_ready(mod.sum_density(x4, use_pallas=True))
    ref4 = jnp.sum(x4, axis=(1, 2, 3))
    np.testing.assert_allclose(np.asarray(dens4), np.asarray(ref4),
                               rtol=1e-6, atol=1e-3)

    # Force multiple feature tiles (nf > 1) to exercise the cross-step
    # accumulator init/finalize with a small feature-tile override.
    dens5 = jax.block_until_ready(
        sum_density_pallas(x3.reshape(37, -1), max_feature_tile=512))
    np.testing.assert_allclose(np.asarray(dens5), np.asarray(ref3),
                               rtol=1e-6, atol=1e-3)

    # Default dispatch (small-input fast path) agrees with the kernel path.
    dens_fast = jax.block_until_ready(mod.sum_density(x))
    np.testing.assert_allclose(np.asarray(dens_fast), np.asarray(ref),
                               rtol=1e-6, atol=1e-5)

    # Abstract forward/backward match the PyTorch stubs (return None).
    assert mod.forward(x) is None
    assert mod.backward(x) is None
    assert mod.npar == 0

    print("KERNEL_OK")
</pallas_src>

<mosaic_0001>
module attributes {stable_mosaic.version = 11 : i64} {
  func.func @kernel(%arg0: i32, %arg1: i32, %arg2: memref<8x1024xf32, #tpu.memory_space<vmem>>, %arg3: memref<8x1xf32, #tpu.memory_space<vmem>>, %arg4: memref<8x128xf32, #tpu.memory_space<vmem>>) attributes {dimension_semantics = [#tpu.dimension_semantics<parallel>, #tpu.dimension_semantics<arbitrary>], iteration_bounds = array<i64: 1, 1>, scalar_prefetch = 0 : i64, scratch_operands = 1 : i64, tpu.core_type = #tpu.core_type<tc>, window_params = [{transform_indices = @transform_0, window_bounds = array<i64: 8, 1024>}, {transform_indices = @transform_1, window_bounds = array<i64: 8, 1>}]} {
    %c0_i32 = arith.constant 0 : i32
    %0 = arith.cmpi eq, %arg1, %c0_i32 : i32
    %1 = arith.extui %0 : i1 to i32
    %c0_i32_0 = arith.constant 0 : i32
    %2 = arith.cmpi ne, %1, %c0_i32_0 : i32
    scf.if %2 {
      %cst = arith.constant 0.000000e+00 : f32
      %38 = vector.broadcast %cst : f32 to vector<8x128xf32>
      %c0_43 = arith.constant 0 : index
      %c0_44 = arith.constant 0 : index
      %39 = vector.load %arg4[%c0_43, %c0_44] : memref<8x128xf32, #tpu.memory_space<vmem>>, vector<8x128xf32>
      tpu.vector_store %arg4[%c0_43, %c0_44], %38 {strides = array<i32>} : memref<8x128xf32, #tpu.memory_space<vmem>>, vector<8x128xf32>,
    } else {
    }
    %c0 = arith.constant 0 : index
    %c0_1 = arith.constant 0 : index
    %3 = vector.load %arg2[%c0, %c0_1] : memref<8x1024xf32, #tpu.memory_space<vmem>>, vector<8x128xf32>
    %c0_2 = arith.constant 0 : index
    %c0_3 = arith.constant 0 : index
    %4 = vector.load %arg4[%c0_2, %c0_3] : memref<8x128xf32, #tpu.memory_space<vmem>>, vector<8x128xf32>
    %5 = arith.addf %4, %3 : vector<8x128xf32>
    %c0_4 = arith.constant 0 : index
    %c0_5 = arith.constant 0 : index
    %6 = vector.load %arg4[%c0_4, %c0_5] : memref<8x128xf32, #tpu.memory_space<vmem>>, vector<8x128xf32>
    tpu.vector_store %arg4[%c0_4, %c0_5], %5 {strides = array<i32>} : memref<8x128xf32, #tpu.memory_space<vmem>>, vector<8x128xf32>,
    %c0_6 = arith.constant 0 : index
    %c128 = arith.constant 128 : index
    %7 = vector.load %arg2[%c0_6, %c128] : memref<8x1024xf32, #tpu.memory_space<vmem>>, vector<8x128xf32>
    %c0_7 = arith.constant 0 : index
    %c0_8 = arith.constant 0 : index
    %8 = vector.load %arg4[%c0_7, %c0_8] : memref<8x128xf32, #tpu.memory_space<vmem>>, vector<8x128xf32>
    %9 = arith.addf %8, %7 : vector<8x128xf32>
    %c0_9 = arith.constant 0 : index
    %c0_10 = arith.constant 0 : index
    %10 = vector.load %arg4[%c0_9, %c0_10] : memref<8x128xf32, #tpu.memory_space<vmem>>, vector<8x128xf32>
    tpu.vector_store %arg4[%c0_9, %c0_10], %9 {strides = array<i32>} : memref<8x128xf32, #tpu.memory_space<vmem>>, vector<8x128xf32>,
    %c0_11 = arith.constant 0 : index
    %c256 = arith.constant 256 : index
    %11 = vector.load %arg2[%c0_11, %c256] : memref<8x1024xf32, #tpu.memory_space<vmem>>, vector<8x128xf32>
    %c0_12 = arith.constant 0 : index
    %c0_13 = arith.constant 0 : index
    %12 = vector.load %arg4[%c0_12, %c0_13] : memref<8x128xf32, #tpu.memory_space<vmem>>, vector<8x128xf32>
    %13 = arith.addf %12, %11 : vector<8x128xf32>
    %c0_14 = arith.constant 0 : index
    %c0_15 = arith.constant 0 : index
    %14 = vector.load %arg4[%c0_14, %c0_15] : memref<8x128xf32, #tpu.memory_space<vmem>>, vector<8x128xf32>
    tpu.vector_store %arg4[%c0_14, %c0_15], %13 {strides = array<i32>} : memref<8x128xf32, #tpu.memory_space<vmem>>, vector<8x128xf32>,
    %c0_16 = arith.constant 0 : index
    %c384 = arith.constant 384 : index
    %15 = vector.load %arg2[%c0_16, %c384] : memref<8x1024xf32, #tpu.memory_space<vmem>>, vector<8x128xf32>
    %c0_17 = arith.constant 0 : index
    %c0_18 = arith.constant 0 : index
    %16 = vector.load %arg4[%c0_17, %c0_18] : memref<8x128xf32, #tpu.memory_space<vmem>>, vector<8x128xf32>
    %17 = arith.addf %16, %15 : vector<8x128xf32>
    %c0_19 = arith.constant 0 : index
    %c0_20 = arith.constant 0 : index
    %18 = vector.load %arg4[%c0_19, %c0_20] : memref<8x128xf32, #tpu.memory_space<vmem>>, vector<8x128xf32>
    tpu.vector_store %arg4[%c0_19, %c0_20], %17 {strides = array<i32>} : memref<8x128xf32, #tpu.memory_space<vmem>>, vector<8x128xf32>,
    %c0_21 = arith.constant 0 : index
    %c512 = arith.constant 512 : index
    %19 = vector.load %arg2[%c0_21, %c512] : memref<8x1024xf32, #tpu.memory_space<vmem>>, vector<8x128xf32>
    %c0_22 = arith.constant 0 : index
    %c0_23 = arith.constant 0 : index
    %20 = vector.load %arg4[%c0_22, %c0_23] : memref<8x128xf32, #tpu.memory_space<vmem>>, vector<8x128xf32>
    %21 = arith.addf %20, %19 : vector<8x128xf32>
    %c0_24 = arith.constant 0 : index
    %c0_25 = arith.constant 0 : index
    %22 = vector.load %arg4[%c0_24, %c0_25] : memref<8x128xf32, #tpu.memory_space<vmem>>, vector<8x128xf32>
    tpu.vector_store %arg4[%c0_24, %c0_25], %21 {strides = array<i32>} : memref<8x128xf32, #tpu.memory_space<vmem>>, vector<8x128xf32>,
    %c0_26 = arith.constant 0 : index
    %c640 = arith.constant 640 : index
    %23 = vector.load %arg2[%c0_26, %c640] : memref<8x1024xf32, #tpu.memory_space<vmem>>, vector<8x128xf32>
    %c0_27 = arith.constant 0 : index
    %c0_28 = arith.constant 0 : index
    %24 = vector.load %arg4[%c0_27, %c0_28] : memref<8x128xf32, #tpu.memory_space<vmem>>, vector<8x128xf32>
    %25 = arith.addf %24, %23 : vector<8x128xf32>
    %c0_29 = arith.constant 0 : index
    %c0_30 = arith.constant 0 : index
    %26 = vector.load %arg4[%c0_29, %c0_30] : memref<8x128xf32, #tpu.memory_space<vmem>>, vector<8x128xf32>
    tpu.vector_store %arg4[%c0_29, %c0_30], %25 {strides = array<i32>} : memref<8x128xf32, #tpu.memory_space<vmem>>, vector<8x128xf32>,
    %c0_31 = arith.constant 0 : index
    %c768 = arith.constant 768 : index
    %27 = vector.load %arg2[%c0_31, %c768] : memref<8x1024xf32, #tpu.memory_space<vmem>>, vector<8x128xf32>
    %c0_32 = arith.constant 0 : index
    %c0_33 = arith.constant 0 : index
    %28 = vector.load %arg4[%c0_32, %c0_33] : memref<8x128xf32, #tpu.memory_space<vmem>>, vector<8x128xf32>
    %29 = arith.addf %28, %27 : vector<8x128xf32>
    %c0_34 = arith.constant 0 : index
    %c0_35 = arith.constant 0 : index
    %30 = vector.load %arg4[%c0_34, %c0_35] : memref<8x128xf32, #tpu.memory_space<vmem>>, vector<8x128xf32>
    tpu.vector_store %arg4[%c0_34, %c0_35], %29 {strides = array<i32>} : memref<8x128xf32, #tpu.memory_space<vmem>>, vector<8x128xf32>,
    %c0_36 = arith.constant 0 : index
    %c896 = arith.constant 896 : index
    %31 = vector.load %arg2[%c0_36, %c896] : memref<8x1024xf32, #tpu.memory_space<vmem>>, vector<8x128xf32>
    %c0_37 = arith.constant 0 : index
    %c0_38 = arith.constant 0 : index
    %32 = vector.load %arg4[%c0_37, %c0_38] : memref<8x128xf32, #tpu.memory_space<vmem>>, vector<8x128xf32>
    %33 = arith.addf %32, %31 : vector<8x128xf32>
    %c0_39 = arith.constant 0 : index
    %c0_40 = arith.constant 0 : index
    %34 = vector.load %arg4[%c0_39, %c0_40] : memref<8x128xf32, #tpu.memory_space<vmem>>, vector<8x128xf32>
    tpu.vector_store %arg4[%c0_39, %c0_40], %33 {strides = array<i32>} : memref<8x128xf32, #tpu.memory_space<vmem>>, vector<8x128xf32>,
    %c0_i32_41 = arith.constant 0 : i32
    %35 = arith.cmpi eq, %arg1, %c0_i32_41 : i32
    %36 = arith.extui %35 : i1 to i32
    %c0_i32_42 = arith.constant 0 : i32
    %37 = arith.cmpi ne, %36, %c0_i32_42 : i32
    scf.if %37 {
      %c0_43 = arith.constant 0 : index
      %c0_44 = arith.constant 0 : index
      %38 = vector.load %arg4[%c0_43, %c0_44] : memref<8x128xf32, #tpu.memory_space<vmem>>, vector<8x128xf32>
      %cst = arith.constant dense<0.000000e+00> : vector<8xf32>
      %39 = vector.multi_reduction <add>, %38, %cst [1] : vector<8x128xf32> to vector<8xf32>
      %40 = vector.shape_cast %39 : vector<8xf32> to vector<8x1xf32>
      %c0_45 = arith.constant 0 : index
      %c0_46 = arith.constant 0 : index
      %41 = vector.load %arg3[%c0_45, %c0_46] : memref<8x1xf32, #tpu.memory_space<vmem>>, vector<8x1xf32>
      tpu.vector_store %arg3[%c0_45, %c0_46], %40 {strides = array<i32>} : memref<8x1xf32, #tpu.memory_space<vmem>>, vector<8x1xf32>,
    } else {
    }
    return
  }
  func.func @transform_0(%arg0: i32, %arg1: i32) -> (i32, i32) {
    %c0_i32 = arith.constant 0 : i32
    return %arg0, %arg1 : i32, i32
  }
  func.func @transform_1(%arg0: i32, %arg1: i32) -> (i32, i32) {
    %c0_i32 = arith.constant 0 : i32
    %c0_i32_0 = arith.constant 0 : i32
    return %arg0, %c0_i32 : i32, i32
  }
}

</mosaic_0001>

<bundles_post_ra>
// kernel: tpu_custom_call.1
= control target key start
LH: loop header
LB: loop body
LE: loop exit
PB: predicated region body
PF: predicated region fallthrough
CT: control target
= control target key end

     0   :  { %6 = vsyncpa [#allocation4], 0  ;;  %s380_s0 = inlined_call_operand.hbm [shape: f32[2,1024], index: 0, kind: input, shape index: {}]   ;;  %s381_s1 = inlined_call_operand.vmem [shape: f32[2,1], index: 1, kind: output, shape index: {}]  }
   0x1   :  { %11 = vsyncadd [#allocation4], 768  ;;  %s351_s6 = smov [#allocation3]   ;;  %s327_s10 = scalar_lea.hbm %s380_s0, 256 }
   0x2   :  { %s12_s7 = sshll.u32 %s351_s6, 4  ;;  %p328_p0 = scmp.ne.s32.totalorder %s380_s0, %s327_s10  ;;  %s13_s7 = int_to_ptr.vmem [resolvable:$true] %s12_s7 }
   0x3   :  { %p331_p1 = scmp.lt.u32.totalorder %s327_s10, %s380_s0 }
   0x5   :  { %p333_p2 = pnand %p331_p1, %p328_p0 }
   0x7   :  { %336 = shalt.err (!%p333_p2)
}
   0x8   :  { %s337_s15 = scalar_lea.vmem %s13_s7, 256  ;;  %s341_s16 = scalar_lea.vmem %s13_s7, 1024 }
   0x9   :  { %p338_p3 = scmp.ne.s32.totalorder %s13_s7, %s337_s15  ;;  %p342_p4 = scmp.lt.s32.totalorder %s13_s7, %s13_s7 }
   0xa   :  { %p343_p5 = scmp.lt.s32.totalorder %s341_s16, %s337_s15 }
   0xc   :  { %p344_p6 = por %p343_p5, %p342_p4 }
   0xe   :  { %p345_p7 = pnand %p344_p6, %p338_p3 }
  0x10   :  { %348 = shalt.err (!%p345_p7)
}
  0x11   :  { %s352_s17 = smov 256   ;;  %s353_s18 = smov 16  }
  0x12   :  { %18 = dma.hbm_to_vmem [thread:$0]  %s380_s0, 256, %s13_s7, [#allocation4], %s352_s17, %s352_s17, %s353_s18  }
  0x13   :  { %349 = dma.done.wait [#allocation4], 1024  }
  0x14   :  { %350 = vsyncadd [#allocation4], 4294966272  ;;  %v41_v0 = vlaneseq  ;;  %v354_v1 = vmov 1983009808   ;;  %vm265_vm0 = vcmask 7168  }
  0x15   :  { %v39_v2 = vunpack.c.l.s4 %v354_v1  ;;  %v311_v6 = vld [vmem:[#allocation3] ss:$16 sps:$4 sm:$0x33]   ;;  %v313_v10 = vld [vmem:[#allocation3 + $0x2] ss:$16 sps:$4 sm:$0x33]  }
  0x16   :  { %v42_v3 = vshrl.u32 %v41_v0, 7  ;;  %v312_v7 = vld [vmem:[#allocation3 + $0x20] ss:$16 sps:$4 sm:$0x33]  }
  0x17   :  { %v40_v4 = vunpack.c.0.s8 %v39_v2  ;;  %v314_v11 = vld [vmem:[#allocation3 + $0x22] ss:$16 sps:$4 sm:$0x33]   ;;  %v315_v15 = vld [vmem:[#allocation3 + $0x4] ss:$16 sps:$4 sm:$0x33]  }
  0x18   :  { %v316_v16 = vld [vmem:[#allocation3 + $0x24] ss:$16 sps:$4 sm:$0x33]   ;;  %v317_v20 = vld [vmem:[#allocation3 + $0x6] ss:$16 sps:$4 sm:$0x33]  }
  0x19   :  { %v43_v5 = vsub.s32 %v40_v4, %v42_v3  ;;  %v318_v21 = vld [vmem:[#allocation3 + $0x26] ss:$16 sps:$4 sm:$0x33]   ;;  %v319_v26 = vld [vmem:[#allocation3 + $0x8] ss:$16 sps:$4 sm:$0x33]  }
  0x1a   :  { %v320_v27 = vld [vmem:[#allocation3 + $0x28] ss:$16 sps:$4 sm:$0x33]   ;;  %v321_v32 = vld [vmem:[#allocation3 + $0xa] ss:$16 sps:$4 sm:$0x33]  }
  0x1b   :  { %v44_v8 = vrot.slane %v311_v6, %v43_v5  ;;  %v51_v9 = vrot.slane %v312_v7, %v43_v5  ;;  %v73_v13 = vrot.slane %v313_v10, %v43_v5  ;;  %v80_v14 = vrot.slane %v314_v11, %v43_v5  ;;  %v322_v33 = vld [vmem:[#allocation3 + $0x2a] ss:$16 sps:$4 sm:$0x33]   ;;  %v323_v38 = vld [vmem:[#allocation3 + $0xc] ss:$16 sps:$4 sm:$0x33]  }
  0x1c   :  { %v102_v18 = vrot.slane %v315_v15, %v43_v5  ;;  %v109_v19 = vrot.slane %v316_v16, %v43_v5  ;;  %v131_v24 = vrot.slane %v317_v20, %v43_v5  ;;  %v138_v25 = vrot.slane %v318_v21, %v43_v5  ;;  %v324_v39 = vld [vmem:[#allocation3 + $0x2c] ss:$16 sps:$4 sm:$0x33]   ;;  %v325_v44 = vld [vmem:[#allocation3 + $0xe] ss:$16 sps:$4 sm:$0x33]  }
  0x1d   :  { %v52_v12 = vcombine.low %v44_v8, %v51_v9  ;;  %v81_v17 = vcombine.low %v73_v13, %v80_v14  ;;  %v160_v30 = vrot.slane %v319_v26, %v43_v5  ;;  %v167_v31 = vrot.slane %v320_v27, %v43_v5  ;;  %v326_v45 = vld [vmem:[#allocation3 + $0x2e] ss:$16 sps:$4 sm:$0x33]  }
  0x1e   :  { %v110_v23 = vcombine.low %v102_v18, %v109_v19  ;;  %v139_v29 = vcombine.low %v131_v24, %v138_v25  ;;  %v189_v36 = vrot.slane %v321_v32, %v43_v5  ;;  %v196_v37 = vrot.slane %v322_v33, %v43_v5 }
  0x1f   :  { %v83_v22 = vadd.f32 %v81_v17, %v52_v12  ;;  %v168_v35 = vcombine.low %v160_v30, %v167_v31  ;;  %v218_v42 = vrot.slane %v323_v38, %v43_v5  ;;  %v225_v43 = vrot.slane %v324_v39, %v43_v5 }
  0x20   :  { %v197_v41 = vcombine.low %v189_v36, %v196_v37  ;;  %v247_v48 = vrot.slane %v325_v44, %v43_v5  ;;  %v254_v49 = vrot.slane %v326_v45, %v43_v5 }
  0x21   :  { %v112_v28 = vadd.f32 %v110_v23, %v83_v22  ;;  %v226_v47 = vcombine.low %v218_v42, %v225_v43 }
  0x22   :  { %v255_v51 = vcombine.low %v247_v48, %v254_v49 }
  0x23   :  { %v141_v34 = vadd.f32 %v139_v29, %v112_v28 }
  0x25   :  { %v170_v40 = vadd.f32 %v168_v35, %v141_v34 }
  0x27   :  { %v199_v46 = vadd.f32 %v197_v41, %v170_v40 }
  0x29   :  { %v228_v50 = vadd.f32 %v226_v47, %v199_v46 }
  0x2b   :  { %v257_v52 = vadd.f32 %v255_v51, %v228_v50 }
  0x2d   :  { %263 = vadd.xlane.f32.xlu0 %v257_v52 }
  0xba   :  { %v264_v53 = vpop.xlane.xlu0 %263 }
  0xbb   :  { %266 = vst.msk [vmem:[#allocation5] sm:$0xff] %vm265_vm0, %v264_v53 }
  0xc2   :  { %v284_v54 = vld [vmem:[#allocation5] sm:$0x3] }
  0xc3   :  { %285 = vst [vmem:[%s381_s1] sm:$0x3] %v284_v54 }
  0xc4   :  { %302 = vsyncpa [#allocation4], 1 }

</bundles_post_ra>
